<compile_context>
chip_gen: v6e
topology: v6e:2x2x1
jax: 0.10.0
libtpu: 0.0.40
codegen_flags: <defaults>
</compile_context>

<pallas_src>
import jax
import jax.numpy as jnp
from jax.experimental import pallas as pl
from jax.experimental.pallas import tpu as pltpu


def _realnvp_kernel(xa_ref, xb_ref, c_ref,
                    w1a_ref, w1c_ref, b1_ref,
                    w2_ref, b2_ref,
                    wst_ref, bst_ref,
                    x_out_ref, ld_out_ref):
    n_flows, _, n_half = w1a_ref.shape          # w1a: (F, H, n_half)

    x_a = xa_ref[...]                           # (n_half, TB)  batch on lanes
    x_b = xb_ref[...]                           # (n_half, TB)
    cond = c_ref[...]                           # (C, TB)
    log_det = jnp.zeros(ld_out_ref.shape, jnp.float32)

    # n_flows is static & tiny -> fully unrolled at trace time; the a/b swap
    # below is zero-cost renaming (no concat per flow).
    for k in range(n_flows):
        h1 = (jnp.dot(w1a_ref[k], x_a, preferred_element_type=jnp.float32)
              + jnp.dot(w1c_ref[k], cond, preferred_element_type=jnp.float32)
              + b1_ref[k])                      # (H, TB); bias (H,1) lane-bcast
        h1 = jnp.maximum(h1, 0.0)
        h2 = jnp.dot(w2_ref[k], h1, preferred_element_type=jnp.float32) + b2_ref[k]
        h2 = jnp.maximum(h2, 0.0)
        st = (jnp.dot(wst_ref[k], h2, preferred_element_type=jnp.float32)
              + bst_ref[k])                     # (2*n_half, TB), fused s||t head
        s = jnp.tanh(st[:n_half, :])            # sublane split, lane-dense EUP
        t = st[n_half:, :]
        x_b_new = jnp.exp(s) * x_b + t          # EUP + VPU FMA on full vregs
        x_a, x_b = x_b_new, x_a                 # torch: x = cat([x_b_new, x_a])
        log_det = log_det + s

    # Write sublane slabs directly (no lane-axis concat, lane-dense stores).
    x_out_ref[:n_half, :] = x_a
    x_out_ref[n_half:, :] = x_b
    ld_out_ref[...] = log_det


def prepare_params(params):
    """One-time weight preparation (hoisted out of the per-call path).

    `params` uses the x @ W + b convention (torch nn.Linear weights already
    transposed), stacked over flows:
        w1:(F, n_half+C, H)  b1:(F, H)   w2:(F, H, H)      b2:(F, H)
        ws:(F, H, n_half)    bs:(F, n_half)  wt:(F, H, n_half)  bt:(F, n_half)

    The kernel runs on the transposed, batch-on-lanes layout (h^T = W^T @ x^T),
    so here we transpose back to (out, in), split w1 into the x_a / c parts
    (kills the in-kernel [x_a, c] concat) and fuse the s/t heads on the
    output (sublane) axis.
    """
    w1 = params["w1"]
    n_half = params["ws"].shape[2]
    w1_t = jnp.swapaxes(w1, 1, 2)                                  # (F, H, n_half+C)
    prep = {
        "w1a": w1_t[:, :, :n_half],                                # (F, H, n_half)
        "w1c": w1_t[:, :, n_half:],                                # (F, H, C)
        "b1":  params["b1"][:, :, None],                           # (F, H, 1)
        "w2":  jnp.swapaxes(params["w2"], 1, 2),                   # (F, H, H)
        "b2":  params["b2"][:, :, None],                           # (F, H, 1)
        "wst": jnp.concatenate([jnp.swapaxes(params["ws"], 1, 2),
                                jnp.swapaxes(params["wt"], 1, 2)],
                               axis=1),                            # (F, 2*n_half, H)
        "bst": jnp.concatenate([params["bs"], params["bt"]],
                               axis=1)[:, :, None],                # (F, 2*n_half, 1)
    }
    return jax.tree_util.tree_map(lambda a: a.astype(jnp.float32), prep)


def _pick_batch_tile(batch, batch_tile):
    """Lane-axis tile size: multiple of 128, or the full (small) batch."""
    batch_tile = max(128, (int(batch_tile) // 128) * 128)
    if batch > batch_tile:
        return batch_tile
    if batch >= 256:
        # Keep >= 2 tiles so the "parallel" axis can shard across v7x's two
        # TensorCores (harmless on single-TC v5e/v6e).
        half = -(-batch // 2)
        return max(128, ((half + 127) // 128) * 128)
    return batch  # single tile; lane extent equals the full batch dimension


def _forward_transposed(xa_t, xb_t, c_t, prep, *, batch_tile=2048):
    """Kernel call on the batch-on-lanes layout. Inputs: (n_half,B),(n_half,B),(C,B)."""
    n_half, B = xa_t.shape
    C = c_t.shape[0]
    D = 2 * n_half
    w1a, w1c, b1 = prep["w1a"], prep["w1c"], prep["b1"]
    w2, b2, wst, bst = prep["w2"], prep["b2"], prep["wst"], prep["bst"]
    n_flows, H, _ = w1a.shape

    TB = _pick_batch_tile(B, batch_tile)
    grid = (pl.cdiv(B, TB),)        # ragged last block: no jnp.pad, no extra HBM copy

    def _const_spec(arr):
        nd = arr.ndim
        return pl.BlockSpec(arr.shape, lambda i, _nd=nd: (0,) * _nd)

    grid_spec = pltpu.PrefetchScalarGridSpec(
        num_scalar_prefetch=0,
        grid=grid,
        in_specs=[
            pl.BlockSpec((n_half, TB), lambda i: (0, i)),   # x_a^T lane tile
            pl.BlockSpec((n_half, TB), lambda i: (0, i)),   # x_b^T lane tile
            pl.BlockSpec((C, TB), lambda i: (0, i)),        # c^T   lane tile
            _const_spec(w1a), _const_spec(w1c), _const_spec(b1),
            _const_spec(w2), _const_spec(b2),
            _const_spec(wst), _const_spec(bst),
        ],
        out_specs=[
            pl.BlockSpec((D, TB), lambda i: (0, i)),        # x_out^T
            pl.BlockSpec((n_half, TB), lambda i: (0, i)),   # log_det^T
        ],
    )

    # Advisory cost estimate: the kernel is layout/DMA/overhead bound, not MXU
    # bound, so just tell XLA roughly what it costs.
    matmul_flops = 2 * n_flows * (n_half * H + C * H + H * H + H * 2 * n_half)
    elementwise_flops = n_flows * (3 * H + 3 * n_half)
    weight_bytes = sum(int(a.size) * 4 for a in (w1a, w1c, b1, w2, b2, wst, bst))
    io_bytes = 4 * B * (D + C + D + n_half)
    cost = pl.CostEstimate(
        flops=B * (matmul_flops + elementwise_flops),
        transcendentals=B * n_flows * 2 * n_half,
        bytes_accessed=io_bytes + weight_bytes,
    )

    return pl.pallas_call(
        _realnvp_kernel,
        out_shape=(
            jax.ShapeDtypeStruct((D, B), jnp.float32),
            jax.ShapeDtypeStruct((n_half, B), jnp.float32),
        ),
        grid_spec=grid_spec,
        compiler_params=pltpu.CompilerParams(
            dimension_semantics=("parallel",)),
        cost_estimate=cost,
    )(xa_t, xb_t, c_t, w1a, w1c, b1, w2, b2, wst, bst)


def conditional_realnvp_forward(x, c, prep, *, batch_tile=2048):
    """Matches torch ConditionalRealNVP.forward: returns (x_out, log_det_jacobian).

    x: (B, data_dim) f32, c: (B, condition_dim) f32, prep = prepare_params(...).
    Callers that already hold batch-on-lanes (transposed) data can call
    _forward_transposed directly and skip the wrapper transposes.
    """
    B, D = x.shape
    assert D % 2 == 0 and c.shape[0] == B
    n_half = D // 2
    x_t = x.astype(jnp.float32).T                     # (D, B)
    c_t = c.astype(jnp.float32).T                     # (C, B)
    x_out_t, ld_t = _forward_transposed(
        x_t[:n_half], x_t[n_half:], c_t, prep, batch_tile=batch_tile)
    return x_out_t.T, ld_t.T


def _ref_forward(x, c, params):
    """Pure-JAX reference mirroring the PyTorch module exactly."""
    n_half = x.shape[1] // 2
    log_det = jnp.zeros((x.shape[0], n_half), jnp.float32)
    n_flows = params["w1"].shape[0]
    for k in range(n_flows):
        x_a, x_b = x[:, :n_half], x[:, n_half:]
        x_a_c = jnp.concatenate([x_a, c], axis=1)
        h = jax.nn.relu(x_a_c @ params["w1"][k] + params["b1"][k])
        h = jax.nn.relu(h @ params["w2"][k] + params["b2"][k])
        s = jnp.tanh(h @ params["ws"][k] + params["bs"][k])
        t = h @ params["wt"][k] + params["bt"][k]
        x_b = jnp.exp(s) * x_b + t
        x = jnp.concatenate([x_b, x_a], axis=1)
        log_det = log_det + s
    return x, log_det


if __name__ == "__main__":
    # Small shapes consistent with the module.
    n_flows = 4
    condition_dim = 4
    data_dim = 8          # must be even
    n_hidden = 32
    n_half = data_dim // 2
    in_dim = n_half + condition_dim

    key = jax.random.PRNGKey(0)
    keys = jax.random.split(key, 12)
    scale = 0.3
    params = {
        "w1": scale * jax.random.normal(keys[0], (n_flows, in_dim, n_hidden), jnp.float32),
        "b1": scale * jax.random.normal(keys[1], (n_flows, n_hidden), jnp.float32),
        "w2": scale * jax.random.normal(keys[2], (n_flows, n_hidden, n_hidden), jnp.float32),
        "b2": scale * jax.random.normal(keys[3], (n_flows, n_hidden), jnp.float32),
        "ws": scale * jax.random.normal(keys[4], (n_flows, n_hidden, n_half), jnp.float32),
        "bs": scale * jax.random.normal(keys[5], (n_flows, n_half), jnp.float32),
        "wt": scale * jax.random.normal(keys[6], (n_flows, n_hidden, n_half), jnp.float32),
        "bt": scale * jax.random.normal(keys[7], (n_flows, n_half), jnp.float32),
    }
    prep = prepare_params(params)      # one-time weight prep, reused per call

    # Case 1: tiny batch -> single lane tile (lane extent == batch).
    batch = 8
    x = jax.random.normal(keys[8], (batch, data_dim), jnp.float32)
    c = jax.random.normal(keys[9], (batch, condition_dim), jnp.float32)
    x_out, log_det = conditional_realnvp_forward(x, c, prep)
    jax.block_until_ready((x_out, log_det))
    x_ref, ld_ref = _ref_forward(x, c, params)
    assert jnp.allclose(x_out, x_ref, atol=1e-4, rtol=1e-4), "x mismatch"
    assert jnp.allclose(log_det, ld_ref, atol=1e-4, rtol=1e-4), "log_det mismatch"

    # Case 2: larger batch -> >= 2 lane tiles (parallel grid axis) and a
    # ragged last block (no padding copies).
    batch2 = 300
    x2 = jax.random.normal(keys[10], (batch2, data_dim), jnp.float32)
    c2 = jax.random.normal(keys[11], (batch2, condition_dim), jnp.float32)
    x_out2, log_det2 = conditional_realnvp_forward(x2, c2, prep)
    jax.block_until_ready((x_out2, log_det2))
    x_ref2, ld_ref2 = _ref_forward(x2, c2, params)
    assert jnp.allclose(x_out2, x_ref2, atol=1e-4, rtol=1e-4), "x mismatch (tiled)"
    assert jnp.allclose(log_det2, ld_ref2, atol=1e-4, rtol=1e-4), "log_det mismatch (tiled)"

    # TODO(synk): ConditionalRealNVP.inverse is not implemented (only the
    # forward pass was requested); it would be a mirror kernel of this one.
    print("KERNEL_OK")
</pallas_src>

<mosaic_0001>
module attributes {stable_mosaic.version = 11 : i64} {
  func.func @_realnvp_kernel(%arg0: i32, %arg1: memref<4x8xf32, #tpu.memory_space<vmem>>, %arg2: memref<4x8xf32, #tpu.memory_space<vmem>>, %arg3: memref<4x8xf32, #tpu.memory_space<vmem>>, %arg4: memref<4x32x4xf32, #tpu.memory_space<vmem>>, %arg5: memref<4x32x4xf32, #tpu.memory_space<vmem>>, %arg6: memref<4x32x1xf32, #tpu.memory_space<vmem>>, %arg7: memref<4x32x32xf32, #tpu.memory_space<vmem>>, %arg8: memref<4x32x1xf32, #tpu.memory_space<vmem>>, %arg9: memref<4x8x32xf32, #tpu.memory_space<vmem>>, %arg10: memref<4x8x1xf32, #tpu.memory_space<vmem>>, %arg11: memref<8x8xf32, #tpu.memory_space<vmem>>, %arg12: memref<4x8xf32, #tpu.memory_space<vmem>>) attributes {dimension_semantics = [#tpu.dimension_semantics<parallel>], iteration_bounds = array<i64: 1>, scalar_prefetch = 0 : i64, scratch_operands = 0 : i64, tpu.core_type = #tpu.core_type<tc>, window_params = [{transform_indices = @transform_0, window_bounds = array<i64: 4, 8>}, {transform_indices = @transform_1, window_bounds = array<i64: 4, 8>}, {transform_indices = @transform_2, window_bounds = array<i64: 4, 8>}, {pipeline_mode = #tpu.pipeline_mode<synchronous>, transform_indices = @transform_3, window_bounds = array<i64: 4, 32, 4>}, {pipeline_mode = #tpu.pipeline_mode<synchronous>, transform_indices = @transform_4, window_bounds = array<i64: 4, 32, 4>}, {pipeline_mode = #tpu.pipeline_mode<synchronous>, transform_indices = @transform_5, window_bounds = array<i64: 4, 32, 1>}, {pipeline_mode = #tpu.pipeline_mode<synchronous>, transform_indices = @transform_6, window_bounds = array<i64: 4, 32, 32>}, {pipeline_mode = #tpu.pipeline_mode<synchronous>, transform_indices = @transform_7, window_bounds = array<i64: 4, 32, 1>}, {pipeline_mode = #tpu.pipeline_mode<synchronous>, transform_indices = @transform_8, window_bounds = array<i64: 4, 8, 32>}, {pipeline_mode = #tpu.pipeline_mode<synchronous>, transform_indices = @transform_9, window_bounds = array<i64: 4, 8, 1>}, {transform_indices = @transform_10, window_bounds = array<i64: 8, 8>}, {transform_indices = @transform_11, window_bounds = array<i64: 4, 8>}]} {
    %c0 = arith.constant 0 : index
    %c0_0 = arith.constant 0 : index
    %0 = vector.load %arg1[%c0, %c0_0] : memref<4x8xf32, #tpu.memory_space<vmem>>, vector<4x8xf32>
    %c0_1 = arith.constant 0 : index
    %c0_2 = arith.constant 0 : index
    %1 = vector.load %arg2[%c0_1, %c0_2] : memref<4x8xf32, #tpu.memory_space<vmem>>, vector<4x8xf32>
    %c0_3 = arith.constant 0 : index
    %c0_4 = arith.constant 0 : index
    %2 = vector.load %arg3[%c0_3, %c0_4] : memref<4x8xf32, #tpu.memory_space<vmem>>, vector<4x8xf32>
    %cst = arith.constant 0.000000e+00 : f32
    %3 = vector.broadcast %cst : f32 to vector<4x8xf32>
    %c0_5 = arith.constant 0 : index
    %c0_6 = arith.constant 0 : index
    %c0_7 = arith.constant 0 : index
    %4 = vector.load %arg4[%c0_5, %c0_6, %c0_7] : memref<4x32x4xf32, #tpu.memory_space<vmem>>, vector<1x32x4xf32>
    %5 = vector.shape_cast %4 : vector<1x32x4xf32> to vector<32x4xf32>
    %cst_8 = arith.constant dense<0.000000e+00> : vector<32x8xf32>
    %6 = tpu.matmul %5, %0, %cst_8 {dimension_numbers = #tpu.dot_dimension_numbers<[1], [0], [0], [1], [0, 0, 1, 1], [], []>} : vector<32x4xf32>, vector<4x8xf32>, vector<32x8xf32> -> vector<32x8xf32>
    %c0_9 = arith.constant 0 : index
    %c0_10 = arith.constant 0 : index
    %c0_11 = arith.constant 0 : index
    %7 = vector.load %arg5[%c0_9, %c0_10, %c0_11] : memref<4x32x4xf32, #tpu.memory_space<vmem>>, vector<1x32x4xf32>
    %8 = vector.shape_cast %7 : vector<1x32x4xf32> to vector<32x4xf32>
    %cst_12 = arith.constant dense<0.000000e+00> : vector<32x8xf32>
    %9 = tpu.matmul %8, %2, %cst_12 {dimension_numbers = #tpu.dot_dimension_numbers<[1], [0], [0], [1], [0, 0, 1, 1], [], []>} : vector<32x4xf32>, vector<4x8xf32>, vector<32x8xf32> -> vector<32x8xf32>
    %10 = arith.addf %6, %9 : vector<32x8xf32>
    %c0_13 = arith.constant 0 : index
    %c0_14 = arith.constant 0 : index
    %c0_15 = arith.constant 0 : index
    %11 = vector.load %arg6[%c0_13, %c0_14, %c0_15] : memref<4x32x1xf32, #tpu.memory_space<vmem>>, vector<1x32x1xf32>
    %12 = vector.shape_cast %11 : vector<1x32x1xf32> to vector<32x1xf32>
    %13 = vector.broadcast %12 : vector<32x1xf32> to vector<32x8xf32>
    %14 = arith.addf %10, %13 : vector<32x8xf32>
    %cst_16 = arith.constant 0.000000e+00 : f32
    %15 = vector.broadcast %cst_16 : f32 to vector<32x8xf32>
    %16 = arith.maximumf %14, %15 : vector<32x8xf32>
    %c0_17 = arith.constant 0 : index
    %c0_18 = arith.constant 0 : index
    %c0_19 = arith.constant 0 : index
    %17 = vector.load %arg7[%c0_17, %c0_18, %c0_19] : memref<4x32x32xf32, #tpu.memory_space<vmem>>, vector<1x32x32xf32>
    %18 = vector.shape_cast %17 : vector<1x32x32xf32> to vector<32x32xf32>
    %cst_20 = arith.constant dense<0.000000e+00> : vector<32x8xf32>
    %19 = tpu.matmul %18, %16, %cst_20 {dimension_numbers = #tpu.dot_dimension_numbers<[1], [0], [0], [1], [0, 0, 1, 1], [], []>} : vector<32x32xf32>, vector<32x8xf32>, vector<32x8xf32> -> vector<32x8xf32>
    %c0_21 = arith.constant 0 : index
    %c0_22 = arith.constant 0 : index
    %c0_23 = arith.constant 0 : index
    %20 = vector.load %arg8[%c0_21, %c0_22, %c0_23] : memref<4x32x1xf32, #tpu.memory_space<vmem>>, vector<1x32x1xf32>
    %21 = vector.shape_cast %20 : vector<1x32x1xf32> to vector<32x1xf32>
    %22 = vector.broadcast %21 : vector<32x1xf32> to vector<32x8xf32>
    %23 = arith.addf %19, %22 : vector<32x8xf32>
    %cst_24 = arith.constant 0.000000e+00 : f32
    %24 = vector.broadcast %cst_24 : f32 to vector<32x8xf32>
    %25 = arith.maximumf %23, %24 : vector<32x8xf32>
    %c0_25 = arith.constant 0 : index
    %c0_26 = arith.constant 0 : index
    %c0_27 = arith.constant 0 : index
    %26 = vector.load %arg9[%c0_25, %c0_26, %c0_27] : memref<4x8x32xf32, #tpu.memory_space<vmem>>, vector<1x8x32xf32>
    %27 = vector.shape_cast %26 : vector<1x8x32xf32> to vector<8x32xf32>
    %cst_28 = arith.constant dense<0.000000e+00> : vector<8x8xf32>
    %28 = tpu.matmul %27, %25, %cst_28 {dimension_numbers = #tpu.dot_dimension_numbers<[1], [0], [0], [1], [0, 0, 1, 1], [], []>} : vector<8x32xf32>, vector<32x8xf32>, vector<8x8xf32> -> vector<8x8xf32>
    %c0_29 = arith.constant 0 : index
    %c0_30 = arith.constant 0 : index
    %c0_31 = arith.constant 0 : index
    %29 = vector.load %arg10[%c0_29, %c0_30, %c0_31] : memref<4x8x1xf32, #tpu.memory_space<vmem>>, vector<1x8x1xf32>
    %30 = vector.shape_cast %29 : vector<1x8x1xf32> to vector<8x1xf32>
    %31 = vector.broadcast %30 : vector<8x1xf32> to vector<8x8xf32>
    %32 = arith.addf %28, %31 : vector<8x8xf32>
    %33 = vector.extract_strided_slice %32 {offsets = [0, 0], sizes = [4, 8], strides = [1, 1]} : vector<8x8xf32> to vector<4x8xf32>
    %34 = math.tanh %33 : vector<4x8xf32>
    %35 = vector.extract_strided_slice %32 {offsets = [4, 0], sizes = [4, 8], strides = [1, 1]} : vector<8x8xf32> to vector<4x8xf32>
    %36 = math.exp %34 : vector<4x8xf32>
    %37 = arith.mulf %36, %1 : vector<4x8xf32>
    %38 = arith.addf %37, %35 : vector<4x8xf32>
    %39 = arith.addf %3, %34 : vector<4x8xf32>
    %c1 = arith.constant 1 : index
    %c0_32 = arith.constant 0 : index
    %c0_33 = arith.constant 0 : index
    %40 = vector.load %arg4[%c1, %c0_32, %c0_33] : memref<4x32x4xf32, #tpu.memory_space<vmem>>, vector<1x32x4xf32>
    %41 = vector.shape_cast %40 : vector<1x32x4xf32> to vector<32x4xf32>
    %cst_34 = arith.constant dense<0.000000e+00> : vector<32x8xf32>
    %42 = tpu.matmul %41, %38, %cst_34 {dimension_numbers = #tpu.dot_dimension_numbers<[1], [0], [0], [1], [0, 0, 1, 1], [], []>} : vector<32x4xf32>, vector<4x8xf32>, vector<32x8xf32> -> vector<32x8xf32>
    %c1_35 = arith.constant 1 : index
    %c0_36 = arith.constant 0 : index
    %c0_37 = arith.constant 0 : index
    %43 = vector.load %arg5[%c1_35, %c0_36, %c0_37] : memref<4x32x4xf32, #tpu.memory_space<vmem>>, vector<1x32x4xf32>
    %44 = vector.shape_cast %43 : vector<1x32x4xf32> to vector<32x4xf32>
    %cst_38 = arith.constant dense<0.000000e+00> : vector<32x8xf32>
    %45 = tpu.matmul %44, %2, %cst_38 {dimension_numbers = #tpu.dot_dimension_numbers<[1], [0], [0], [1], [0, 0, 1, 1], [], []>} : vector<32x4xf32>, vector<4x8xf32>, vector<32x8xf32> -> vector<32x8xf32>
    %46 = arith.addf %42, %45 : vector<32x8xf32>
    %c1_39 = arith.constant 1 : index
    %c0_40 = arith.constant 0 : index
    %c0_41 = arith.constant 0 : index
    %47 = vector.load %arg6[%c1_39, %c0_40, %c0_41] : memref<4x32x1xf32, #tpu.memory_space<vmem>>, vector<1x32x1xf32>
    %48 = vector.shape_cast %47 : vector<1x32x1xf32> to vector<32x1xf32>
    %49 = vector.broadcast %48 : vector<32x1xf32> to vector<32x8xf32>
    %50 = arith.addf %46, %49 : vector<32x8xf32>
    %cst_42 = arith.constant 0.000000e+00 : f32
    %51 = vector.broadcast %cst_42 : f32 to vector<32x8xf32>
    %52 = arith.maximumf %50, %51 : vector<32x8xf32>
    %c1_43 = arith.constant 1 : index
    %c0_44 = arith.constant 0 : index
    %c0_45 = arith.constant 0 : index
    %53 = vector.load %arg7[%c1_43, %c0_44, %c0_45] : memref<4x32x32xf32, #tpu.memory_space<vmem>>, vector<1x32x32xf32>
    %54 = vector.shape_cast %53 : vector<1x32x32xf32> to vector<32x32xf32>
    %cst_46 = arith.constant dense<0.000000e+00> : vector<32x8xf32>
    %55 = tpu.matmul %54, %52, %cst_46 {dimension_numbers = #tpu.dot_dimension_numbers<[1], [0], [0], [1], [0, 0, 1, 1], [], []>} : vector<32x32xf32>, vector<32x8xf32>, vector<32x8xf32> -> vector<32x8xf32>
    %c1_47 = arith.constant 1 : index
    %c0_48 = arith.constant 0 : index
    %c0_49 = arith.constant 0 : index
    %56 = vector.load %arg8[%c1_47, %c0_48, %c0_49] : memref<4x32x1xf32, #tpu.memory_space<vmem>>, vector<1x32x1xf32>
    %57 = vector.shape_cast %56 : vector<1x32x1xf32> to vector<32x1xf32>
    %58 = vector.broadcast %57 : vector<32x1xf32> to vector<32x8xf32>
    %59 = arith.addf %55, %58 : vector<32x8xf32>
    %cst_50 = arith.constant 0.000000e+00 : f32
    %60 = vector.broadcast %cst_50 : f32 to vector<32x8xf32>
    %61 = arith.maximumf %59, %60 : vector<32x8xf32>
    %c1_51 = arith.constant 1 : index
    %c0_52 = arith.constant 0 : index
    %c0_53 = arith.constant 0 : index
    %62 = vector.load %arg9[%c1_51, %c0_52, %c0_53] : memref<4x8x32xf32, #tpu.memory_space<vmem>>, vector<1x8x32xf32>
    %63 = vector.shape_cast %62 : vector<1x8x32xf32> to vector<8x32xf32>
    %cst_54 = arith.constant dense<0.000000e+00> : vector<8x8xf32>
    %64 = tpu.matmul %63, %61, %cst_54 {dimension_numbers = #tpu.dot_dimension_numbers<[1], [0], [0], [1], [0, 0, 1, 1], [], []>} : vector<8x32xf32>, vector<32x8xf32>, vector<8x8xf32> -> vector<8x8xf32>
    %c1_55 = arith.constant 1 : index
    %c0_56 = arith.constant 0 : index
    %c0_57 = arith.constant 0 : index
    %65 = vector.load %arg10[%c1_55, %c0_56, %c0_57] : memref<4x8x1xf32, #tpu.memory_space<vmem>>, vector<1x8x1xf32>
    %66 = vector.shape_cast %65 : vector<1x8x1xf32> to vector<8x1xf32>
    %67 = vector.broadcast %66 : vector<8x1xf32> to vector<8x8xf32>
    %68 = arith.addf %64, %67 : vector<8x8xf32>
    %69 = vector.extract_strided_slice %68 {offsets = [0, 0], sizes = [4, 8], strides = [1, 1]} : vector<8x8xf32> to vector<4x8xf32>
    %70 = math.tanh %69 : vector<4x8xf32>
    %71 = vector.extract_strided_slice %68 {offsets = [4, 0], sizes = [4, 8], strides = [1, 1]} : vector<8x8xf32> to vector<4x8xf32>
    %72 = math.exp %70 : vector<4x8xf32>
    %73 = arith.mulf %72, %0 : vector<4x8xf32>
    %74 = arith.addf %73, %71 : vector<4x8xf32>
    %75 = arith.addf %39, %70 : vector<4x8xf32>
    %c2 = arith.constant 2 : index
    %c0_58 = arith.constant 0 : index
    %c0_59 = arith.constant 0 : index
    %76 = vector.load %arg4[%c2, %c0_58, %c0_59] : memref<4x32x4xf32, #tpu.memory_space<vmem>>, vector<1x32x4xf32>
    %77 = vector.shape_cast %76 : vector<1x32x4xf32> to vector<32x4xf32>
    %cst_60 = arith.constant dense<0.000000e+00> : vector<32x8xf32>
    %78 = tpu.matmul %77, %74, %cst_60 {dimension_numbers = #tpu.dot_dimension_numbers<[1], [0], [0], [1], [0, 0, 1, 1], [], []>} : vector<32x4xf32>, vector<4x8xf32>, vector<32x8xf32> -> vector<32x8xf32>
    %c2_61 = arith.constant 2 : index
    %c0_62 = arith.constant 0 : index
    %c0_63 = arith.constant 0 : index
    %79 = vector.load %arg5[%c2_61, %c0_62, %c0_63] : memref<4x32x4xf32, #tpu.memory_space<vmem>>, vector<1x32x4xf32>
    %80 = vector.shape_cast %79 : vector<1x32x4xf32> to vector<32x4xf32>
    %cst_64 = arith.constant dense<0.000000e+00> : vector<32x8xf32>
    %81 = tpu.matmul %80, %2, %cst_64 {dimension_numbers = #tpu.dot_dimension_numbers<[1], [0], [0], [1], [0, 0, 1, 1], [], []>} : vector<32x4xf32>, vector<4x8xf32>, vector<32x8xf32> -> vector<32x8xf32>
    %82 = arith.addf %78, %81 : vector<32x8xf32>
    %c2_65 = arith.constant 2 : index
    %c0_66 = arith.constant 0 : index
    %c0_67 = arith.constant 0 : index
    %83 = vector.load %arg6[%c2_65, %c0_66, %c0_67] : memref<4x32x1xf32, #tpu.memory_space<vmem>>, vector<1x32x1xf32>
    %84 = vector.shape_cast %83 : vector<1x32x1xf32> to vector<32x1xf32>
    %85 = vector.broadcast %84 : vector<32x1xf32> to vector<32x8xf32>
    %86 = arith.addf %82, %85 : vector<32x8xf32>
    %cst_68 = arith.constant 0.000000e+00 : f32
    %87 = vector.broadcast %cst_68 : f32 to vector<32x8xf32>
    %88 = arith.maximumf %86, %87 : vector<32x8xf32>
    %c2_69 = arith.constant 2 : index
    %c0_70 = arith.constant 0 : index
    %c0_71 = arith.constant 0 : index
    %89 = vector.load %arg7[%c2_69, %c0_70, %c0_71] : memref<4x32x32xf32, #tpu.memory_space<vmem>>, vector<1x32x32xf32>
    %90 = vector.shape_cast %89 : vector<1x32x32xf32> to vector<32x32xf32>
    %cst_72 = arith.constant dense<0.000000e+00> : vector<32x8xf32>
    %91 = tpu.matmul %90, %88, %cst_72 {dimension_numbers = #tpu.dot_dimension_numbers<[1], [0], [0], [1], [0, 0, 1, 1], [], []>} : vector<32x32xf32>, vector<32x8xf32>, vector<32x8xf32> -> vector<32x8xf32>
    %c2_73 = arith.constant 2 : index
    %c0_74 = arith.constant 0 : index
    %c0_75 = arith.constant 0 : index
    %92 = vector.load %arg8[%c2_73, %c0_74, %c0_75] : memref<4x32x1xf32, #tpu.memory_space<vmem>>, vector<1x32x1xf32>
    %93 = vector.shape_cast %92 : vector<1x32x1xf32> to vector<32x1xf32>
    %94 = vector.broadcast %93 : vector<32x1xf32> to vector<32x8xf32>
    %95 = arith.addf %91, %94 : vector<32x8xf32>
    %cst_76 = arith.constant 0.000000e+00 : f32
    %96 = vector.broadcast %cst_76 : f32 to vector<32x8xf32>
    %97 = arith.maximumf %95, %96 : vector<32x8xf32>
    %c2_77 = arith.constant 2 : index
    %c0_78 = arith.constant 0 : index
    %c0_79 = arith.constant 0 : index
    %98 = vector.load %arg9[%c2_77, %c0_78, %c0_79] : memref<4x8x32xf32, #tpu.memory_space<vmem>>, vector<1x8x32xf32>
    %99 = vector.shape_cast %98 : vector<1x8x32xf32> to vector<8x32xf32>
    %cst_80 = arith.constant dense<0.000000e+00> : vector<8x8xf32>
    %100 = tpu.matmul %99, %97, %cst_80 {dimension_numbers = #tpu.dot_dimension_numbers<[1], [0], [0], [1], [0, 0, 1, 1], [], []>} : vector<8x32xf32>, vector<32x8xf32>, vector<8x8xf32> -> vector<8x8xf32>
    %c2_81 = arith.constant 2 : index
    %c0_82 = arith.constant 0 : index
    %c0_83 = arith.constant 0 : index
    %101 = vector.load %arg10[%c2_81, %c0_82, %c0_83] : memref<4x8x1xf32, #tpu.memory_space<vmem>>, vector<1x8x1xf32>
    %102 = vector.shape_cast %101 : vector<1x8x1xf32> to vector<8x1xf32>
    %103 = vector.broadcast %102 : vector<8x1xf32> to vector<8x8xf32>
    %104 = arith.addf %100, %103 : vector<8x8xf32>
    %105 = vector.extract_strided_slice %104 {offsets = [0, 0], sizes = [4, 8], strides = [1, 1]} : vector<8x8xf32> to vector<4x8xf32>
    %106 = math.tanh %105 : vector<4x8xf32>
    %107 = vector.extract_strided_slice %104 {offsets = [4, 0], sizes = [4, 8], strides = [1, 1]} : vector<8x8xf32> to vector<4x8xf32>
    %108 = math.exp %106 : vector<4x8xf32>
    %109 = arith.mulf %108, %38 : vector<4x8xf32>
    %110 = arith.addf %109, %107 : vector<4x8xf32>
    %111 = arith.addf %75, %106 : vector<4x8xf32>
    %c3 = arith.constant 3 : index
    %c0_84 = arith.constant 0 : index
    %c0_85 = arith.constant 0 : index
    %112 = vector.load %arg4[%c3, %c0_84, %c0_85] : memref<4x32x4xf32, #tpu.memory_space<vmem>>, vector<1x32x4xf32>
    %113 = vector.shape_cast %112 : vector<1x32x4xf32> to vector<32x4xf32>
    %cst_86 = arith.constant dense<0.000000e+00> : vector<32x8xf32>
    %114 = tpu.matmul %113, %110, %cst_86 {dimension_numbers = #tpu.dot_dimension_numbers<[1], [0], [0], [1], [0, 0, 1, 1], [], []>} : vector<32x4xf32>, vector<4x8xf32>, vector<32x8xf32> -> vector<32x8xf32>
    %c3_87 = arith.constant 3 : index
    %c0_88 = arith.constant 0 : index
    %c0_89 = arith.constant 0 : index
    %115 = vector.load %arg5[%c3_87, %c0_88, %c0_89] : memref<4x32x4xf32, #tpu.memory_space<vmem>>, vector<1x32x4xf32>
    %116 = vector.shape_cast %115 : vector<1x32x4xf32> to vector<32x4xf32>
    %cst_90 = arith.constant dense<0.000000e+00> : vector<32x8xf32>
    %117 = tpu.matmul %116, %2, %cst_90 {dimension_numbers = #tpu.dot_dimension_numbers<[1], [0], [0], [1], [0, 0, 1, 1], [], []>} : vector<32x4xf32>, vector<4x8xf32>, vector<32x8xf32> -> vector<32x8xf32>
    %118 = arith.addf %114, %117 : vector<32x8xf32>
    %c3_91 = arith.constant 3 : index
    %c0_92 = arith.constant 0 : index
    %c0_93 = arith.constant 0 : index
    %119 = vector.load %arg6[%c3_91, %c0_92, %c0_93] : memref<4x32x1xf32, #tpu.memory_space<vmem>>, vector<1x32x1xf32>
    %120 = vector.shape_cast %119 : vector<1x32x1xf32> to vector<32x1xf32>
    %121 = vector.broadcast %120 : vector<32x1xf32> to vector<32x8xf32>
    %122 = arith.addf %118, %121 : vector<32x8xf32>
    %cst_94 = arith.constant 0.000000e+00 : f32
    %123 = vector.broadcast %cst_94 : f32 to vector<32x8xf32>
    %124 = arith.maximumf %122, %123 : vector<32x8xf32>
    %c3_95 = arith.constant 3 : index
    %c0_96 = arith.constant 0 : index
    %c0_97 = arith.constant 0 : index
    %125 = vector.load %arg7[%c3_95, %c0_96, %c0_97] : memref<4x32x32xf32, #tpu.memory_space<vmem>>, vector<1x32x32xf32>
    %126 = vector.shape_cast %125 : vector<1x32x32xf32> to vector<32x32xf32>
    %cst_98 = arith.constant dense<0.000000e+00> : vector<32x8xf32>
    %127 = tpu.matmul %126, %124, %cst_98 {dimension_numbers = #tpu.dot_dimension_numbers<[1], [0], [0], [1], [0, 0, 1, 1], [], []>} : vector<32x32xf32>, vector<32x8xf32>, vector<32x8xf32> -> vector<32x8xf32>
    %c3_99 = arith.constant 3 : index
    %c0_100 = arith.constant 0 : index
    %c0_101 = arith.constant 0 : index
    %128 = vector.load %arg8[%c3_99, %c0_100, %c0_101] : memref<4x32x1xf32, #tpu.memory_space<vmem>>, vector<1x32x1xf32>
    %129 = vector.shape_cast %128 : vector<1x32x1xf32> to vector<32x1xf32>
    %130 = vector.broadcast %129 : vector<32x1xf32> to vector<32x8xf32>
    %131 = arith.addf %127, %130 : vector<32x8xf32>
    %cst_102 = arith.constant 0.000000e+00 : f32
    %132 = vector.broadcast %cst_102 : f32 to vector<32x8xf32>
    %133 = arith.maximumf %131, %132 : vector<32x8xf32>
    %c3_103 = arith.constant 3 : index
    %c0_104 = arith.constant 0 : index
    %c0_105 = arith.constant 0 : index
    %134 = vector.load %arg9[%c3_103, %c0_104, %c0_105] : memref<4x8x32xf32, #tpu.memory_space<vmem>>, vector<1x8x32xf32>
    %135 = vector.shape_cast %134 : vector<1x8x32xf32> to vector<8x32xf32>
    %cst_106 = arith.constant dense<0.000000e+00> : vector<8x8xf32>
    %136 = tpu.matmul %135, %133, %cst_106 {dimension_numbers = #tpu.dot_dimension_numbers<[1], [0], [0], [1], [0, 0, 1, 1], [], []>} : vector<8x32xf32>, vector<32x8xf32>, vector<8x8xf32> -> vector<8x8xf32>
    %c3_107 = arith.constant 3 : index
    %c0_108 = arith.constant 0 : index
    %c0_109 = arith.constant 0 : index
    %137 = vector.load %arg10[%c3_107, %c0_108, %c0_109] : memref<4x8x1xf32, #tpu.memory_space<vmem>>, vector<1x8x1xf32>
    %138 = vector.shape_cast %137 : vector<1x8x1xf32> to vector<8x1xf32>
    %139 = vector.broadcast %138 : vector<8x1xf32> to vector<8x8xf32>
    %140 = arith.addf %136, %139 : vector<8x8xf32>
    %141 = vector.extract_strided_slice %140 {offsets = [0, 0], sizes = [4, 8], strides = [1, 1]} : vector<8x8xf32> to vector<4x8xf32>
    %142 = math.tanh %141 : vector<4x8xf32>
    %143 = vector.extract_strided_slice %140 {offsets = [4, 0], sizes = [4, 8], strides = [1, 1]} : vector<8x8xf32> to vector<4x8xf32>
    %144 = math.exp %142 : vector<4x8xf32>
    %145 = arith.mulf %144, %74 : vector<4x8xf32>
    %146 = arith.addf %145, %143 : vector<4x8xf32>
    %147 = arith.addf %111, %142 : vector<4x8xf32>
    %c0_110 = arith.constant 0 : index
    %c0_111 = arith.constant 0 : index
    %148 = vector.load %arg11[%c0_110, %c0_111] : memref<8x8xf32, #tpu.memory_space<vmem>>, vector<4x8xf32>
    tpu.vector_store %arg11[%c0_110, %c0_111], %146 {strides = array<i32>} : memref<8x8xf32, #tpu.memory_space<vmem>>, vector<4x8xf32>,
    %c4 = arith.constant 4 : index
    %c0_112 = arith.constant 0 : index
    %149 = vector.load %arg11[%c4, %c0_112] : memref<8x8xf32, #tpu.memory_space<vmem>>, vector<4x8xf32>
    tpu.vector_store %arg11[%c4, %c0_112], %110 {strides = array<i32>} : memref<8x8xf32, #tpu.memory_space<vmem>>, vector<4x8xf32>,
    %c0_113 = arith.constant 0 : index
    %c0_114 = arith.constant 0 : index
    %150 = vector.load %arg12[%c0_113, %c0_114] : memref<4x8xf32, #tpu.memory_space<vmem>>, vector<4x8xf32>
    tpu.vector_store %arg12[%c0_113, %c0_114], %147 {strides = array<i32>} : memref<4x8xf32, #tpu.memory_space<vmem>>, vector<4x8xf32>,
    return
  }
  func.func @transform_0(%arg0: i32) -> (i32, i32) {
    %c0_i32 = arith.constant 0 : i32
    %c0_i32_0 = arith.constant 0 : i32
    return %c0_i32, %arg0 : i32, i32
  }
  func.func @transform_1(%arg0: i32) -> (i32, i32) {
    %c0_i32 = arith.constant 0 : i32
    %c0_i32_0 = arith.constant 0 : i32
    return %c0_i32, %arg0 : i32, i32
  }
  func.func @transform_2(%arg0: i32) -> (i32, i32) {
    %c0_i32 = arith.constant 0 : i32
    %c0_i32_0 = arith.constant 0 : i32
    return %c0_i32, %arg0 : i32, i32
  }
  func.func @transform_3(%arg0: i32) -> (i32, i32, i32) {
    %c0_i32 = arith.constant 0 : i32
    %c0_i32_0 = arith.constant 0 : i32
    %c0_i32_1 = arith.constant 0 : i32
    %c0_i32_2 = arith.constant 0 : i32
    return %c0_i32, %c0_i32_0, %c0_i32_1 : i32, i32, i32
  }
  func.func @transform_4(%arg0: i32) -> (i32, i32, i32) {
    %c0_i32 = arith.constant 0 : i32
    %c0_i32_0 = arith.constant 0 : i32
    %c0_i32_1 = arith.constant 0 : i32
    %c0_i32_2 = arith.constant 0 : i32
    return %c0_i32, %c0_i32_0, %c0_i32_1 : i32, i32, i32
  }
  func.func @transform_5(%arg0: i32) -> (i32, i32, i32) {
    %c0_i32 = arith.constant 0 : i32
    %c0_i32_0 = arith.constant 0 : i32
    %c0_i32_1 = arith.constant 0 : i32
    %c0_i32_2 = arith.constant 0 : i32
    return %c0_i32, %c0_i32_0, %c0_i32_1 : i32, i32, i32
  }
  func.func @transform_6(%arg0: i32) -> (i32, i32, i32) {
    %c0_i32 = arith.constant 0 : i32
    %c0_i32_0 = arith.constant 0 : i32
    %c0_i32_1 = arith.constant 0 : i32
    %c0_i32_2 = arith.constant 0 : i32
    return %c0_i32, %c0_i32_0, %c0_i32_1 : i32, i32, i32
  }
  func.func @transform_7(%arg0: i32) -> (i32, i32, i32) {
    %c0_i32 = arith.constant 0 : i32
    %c0_i32_0 = arith.constant 0 : i32
    %c0_i32_1 = arith.constant 0 : i32
    %c0_i32_2 = arith.constant 0 : i32
    return %c0_i32, %c0_i32_0, %c0_i32_1 : i32, i32, i32
  }
  func.func @transform_8(%arg0: i32) -> (i32, i32, i32) {
    %c0_i32 = arith.constant 0 : i32
    %c0_i32_0 = arith.constant 0 : i32
    %c0_i32_1 = arith.constant 0 : i32
    %c0_i32_2 = arith.constant 0 : i32
    return %c0_i32, %c0_i32_0, %c0_i32_1 : i32, i32, i32
  }
  func.func @transform_9(%arg0: i32) -> (i32, i32, i32) {
    %c0_i32 = arith.constant 0 : i32
    %c0_i32_0 = arith.constant 0 : i32
    %c0_i32_1 = arith.constant 0 : i32
    %c0_i32_2 = arith.constant 0 : i32
    return %c0_i32, %c0_i32_0, %c0_i32_1 : i32, i32, i32
  }
  func.func @transform_10(%arg0: i32) -> (i32, i32) {
    %c0_i32 = arith.constant 0 : i32
    %c0_i32_0 = arith.constant 0 : i32
    return %c0_i32, %arg0 : i32, i32
  }
  func.func @transform_11(%arg0: i32) -> (i32, i32) {
    %c0_i32 = arith.constant 0 : i32
    %c0_i32_0 = arith.constant 0 : i32
    return %c0_i32, %arg0 : i32, i32
  }
}

</mosaic_0001>

<bundles_post_ra>
// kernel: tpu_custom_call.1
= control target key start
LH: loop header
LB: loop body
LE: loop exit
PB: predicated region body
PF: predicated region fallthrough
CT: control target
= control target key end

     0   :  { %17 = vsyncpa [#allocation3], 0  ;;  %vm63_vm0 = vcmask 1043456   ;;  %vm50_vm1 = vcmask 31744   ;;  %v2370_v12 = vmov 0   ;;  %s2845_s0 = inlined_call_operand.vmem [shape: f32[4,8], index: 0, kind: input, shape index: {}]   ;;  %s2846_s1 = inlined_call_operand.vmem [shape: f32[4,8], index: 1, kind: input, shape index: {}]   ;;  %s2847_s2 = inlined_call_operand.vmem [shape: f32[4,8], index: 2, kind: input, shape index: {}]   ;;  %s2848_s3 = inlined_call_operand.vmem [shape: f32[4,32,4], index: 3, kind: input, shape index: {}]   ;;  %s2849_s4 = inlined_call_operand.vmem [shape: f32[4,32,4], index: 4, kind: input, shape index: {}]   ;;  %s2850_s5 = inlined_call_operand.vmem [shape: f32[4,32,1], index: 5, kind: input, shape index: {}]   ;;  %s2851_s6 = inlined_call_operand.vmem [shape: f32[4,32,32], index: 6, kind: input, shape index: {}]   ;;  %s2852_s7 = inlined_call_operand.vmem [shape: f32[4,32,1], index: 7, kind: input, shape index: {}]   ;;  %s2853_s8 = inlined_call_operand.vmem [shape: f32[4,8,32], index: 8, kind: input, shape index: {}]   ;;  %s2854_s9 = inlined_call_operand.vmem [shape: f32[4,8,1], index: 9, kind: input, shape index: {}]   ;;  %s2855_s10 = inlined_call_operand.hbm [shape: f32[8,8], index: 10, kind: output, shape index: {0}]   ;;  %s2856_s11 = inlined_call_operand.hbm [shape: f32[4,8], index: 11, kind: output, shape index: {1}]  }
   0x1   :  { %v2438_v0 = vld [vmem:[%s2847_s2] sm:$0xf]  ;;  %v47_v4 = vld [vmem:[%s2849_s4 + $0x8] sm:$0xff]  ;;  %v48_v6 = vld [vmem:[%s2849_s4 + $0x10] sm:$0xff]  ;;  %2308 = vset.pattern.permute.xlu0 %v2370_v12  ;;  %2309 = vset.pattern.permute.xlu1 %v2370_v12 }
   0x2   :  { %v2443_v1 = vld [vmem:[%s2845_s0] sm:$0xf]  ;;  %2139 = vmatprep.subr.msk.mxu0 %vm63_vm0, %v2438_v0  ;;  %v43_v5 = vld [vmem:[%s2848_s3 + $0x8] sm:$0xff]  ;;  %v44_v7 = vld [vmem:[%s2848_s3 + $0x10] sm:$0xff] }
   0x3   :  { %v46_v2 = vld [vmem:[%s2849_s4] sm:$0xff]  ;;  %2147 = vmatprep.subr.msk.mxu1 %vm63_vm0, %v2443_v1  ;;  %2140 = vmatpush3.msk.msra.mxu0 %vm63_vm0, %v2438_v0  ;;  %v255_v8 = vld [vmem:[%s2850_s5 + $0x18] sm:$0xff]  ;;  %v253_v9 = vld [vmem:[%s2850_s5 + $0x8] sm:$0xff] }
   0x4   :  { %v42_v3 = vld [vmem:[%s2848_s3] sm:$0xff]  ;;  %2141 = vmatprep.mubr.msk.f32.mxu0 %vm50_vm1, %v46_v2  ;;  %2148 = vmatpush3.msk.msra.mxu1 %vm63_vm0, %v2443_v1  ;;  %v49_v10 = vld [vmem:[%s2849_s4 + $0x18] sm:$0xff]  ;;  %v254_v13 = vld [vmem:[%s2850_s5 + $0x10] sm:$0xff] }
   0x5   :  { %2149 = vmatprep.mubr.msk.f32.mxu1 %vm50_vm1, %v42_v3  ;;  %2142 = vmatmul.mubr.msk.f32.vlgmr.msra.gmra.mxu0 %vm50_vm1, %v47_v4  ;;  %v45_v11 = vld [vmem:[%s2848_s3 + $0x18] sm:$0xff]  ;;  %v252_v14 = vld [vmem:[%s2850_s5] sm:$0xff]  ;;  %v290_v16 = vld [vmem:[%s2852_s7 + $0x10] sm:$0xff] }
   0x6   :  { %2150 = vmatmul.mubr.msk.f32.vlgmr.msra.gmra.mxu1 %vm50_vm1, %v43_v5  ;;  %2144 = vmatprep.mubr.msk.f32.mxu0 %vm50_vm1, %v48_v6  ;;  %v291_v15 = vld [vmem:[%s2852_s7 + $0x18] sm:$0xff] }
   0x7   :  { %2152 = vmatprep.mubr.msk.f32.mxu1 %vm50_vm1, %v44_v7  ;;  %273 = vperm.xlu0 %2308, %v255_v8  }
   0x8   :  { %263 = vperm.xlu1 %2309, %v253_v9  }
   0x9   :  { %2145 = vmatmul.mubr.msk.f32.gmra.mxu0 %vm50_vm1, %v49_v10 }
   0xa   :  { %2153 = vmatmul.mubr.msk.f32.gmra.mxu1 %vm50_vm1, %v45_v11 }
   0xb   :  { %268 = vperm.xlu0 %2308, %v254_v13  }
   0xc   :  { %258 = vperm.xlu1 %2309, %v252_v14  }
   0xf   :  { %309 = vperm.xlu0 %2308, %v291_v15  }
  0x10   :  { %304 = vperm.xlu1 %2309, %v290_v16  }
  0x11   :  { %18 = vsyncpa [#allocation5], 0  ;;  %v289_v17 = vld [vmem:[%s2852_s7 + $0x8] sm:$0xff]  ;;  %v288_v18 = vld [vmem:[%s2852_s7] sm:$0xff]  ;;  %vm312_vm2 = vcmask 261120   ;;  %v2371_v13 = vmov 0.0  }
  0x12   :  { %v415_v19 = vld [vmem:[%s2854_s9] sm:$0xff]  ;;  %v1957_v20 = vld [vmem:[%s2850_s5 + $0x38] sm:$0xff]  ;;  %v1956_v21 = vld [vmem:[%s2850_s5 + $0x30] sm:$0xff]  ;;  %2169 = vmatprep.subr.mxu1 %v2371_v13  ;;  %vm2372_vm3 = vmmov 0   ;;  %vm1889_vm4 = vcmask 60416   ;;  %s2373_s13 = smov [#allocation4]  }
  0x13   :  { %299 = vperm.xlu0 %2308, %v289_v17   ;;  %v1955_v22 = vld [vmem:[%s2850_s5 + $0x28] sm:$0xff]  ;;  %v1954_v23 = vld [vmem:[%s2850_s5 + $0x20] sm:$0xff]  ;;  %v1965_v24 = vld [vmem:[%s2852_s7 + $0x38] sm:$0xff]  ;;  %2177 = vmatprep.mubr.msk.f32.mxu1 %vm2372_vm3, %v2371_v13  ;;  %s1909_s14 = sshll.u32 %s2373_s13, 4  ;;  %s1910_s14 = int_to_ptr.vmem [resolvable:$true] %s1909_s14 }
  0x14   :  { %294 = vperm.xlu1 %2309, %v288_v18   ;;  %v1964_v25 = vld [vmem:[%s2852_s7 + $0x30] sm:$0xff]  ;;  %v1963_v26 = vld [vmem:[%s2852_s7 + $0x28] sm:$0xff]  ;;  %v1962_v27 = vld [vmem:[%s2852_s7 + $0x20] sm:$0xff]  ;;  %p2331_p1 = scmp.lt.s32.totalorder %s1910_s14, %s1910_s14 }
  0x15   :  { %v1971_v28 = vld [vmem:[%s2854_s9 + $0x8] sm:$0xff]  ;;  %v1994_v29 = vld [vmem:[%s2850_s5 + $0x58] sm:$0xff]  ;;  %v1993_v30 = vld [vmem:[%s2850_s5 + $0x50] sm:$0xff] }
  0x16   :  { %v1992_v31 = vld [vmem:[%s2850_s5 + $0x48] sm:$0xff]  ;;  %v1991_v32 = vld [vmem:[%s2850_s5 + $0x40] sm:$0xff]  ;;  %v2002_v33 = vld [vmem:[%s2852_s7 + $0x58] sm:$0xff] }
  0x17   :  { %418 = vperm.xlu0 %2308, %v415_v19   ;;  %v2001_v34 = vld [vmem:[%s2852_s7 + $0x50] sm:$0xff]  ;;  %v2000_v35 = vld [vmem:[%s2852_s7 + $0x48] sm:$0xff]  ;;  %v1999_v36 = vld [vmem:[%s2852_s7 + $0x40] sm:$0xff] }
  0x18   :  { %732 = vperm.xlu1 %2309, %v1957_v20   ;;  %v2008_v37 = vld [vmem:[%s2854_s9 + $0x10] sm:$0xff]  ;;  %v2031_v38 = vld [vmem:[%s2850_s5 + $0x78] sm:$0xff]  ;;  %v2029_v40 = vld [vmem:[%s2850_s5 + $0x68] sm:$0xff] }
  0x19   :  { %v2030_v39 = vld [vmem:[%s2850_s5 + $0x70] sm:$0xff]  ;;  %v2028_v41 = vld [vmem:[%s2850_s5 + $0x60] sm:$0xff]  ;;  %v2039_v42 = vld [vmem:[%s2852_s7 + $0x78] sm:$0xff] }
  0x1a   :  { %v2038_v43 = vld [vmem:[%s2852_s7 + $0x70] sm:$0xff]  ;;  %v2037_v44 = vld [vmem:[%s2852_s7 + $0x68] sm:$0xff]  ;;  %v2036_v45 = vld [vmem:[%s2852_s7 + $0x60] sm:$0xff] }
  0x1b   :  { %727 = vperm.xlu0 %2308, %v1956_v21   ;;  %v2045_v46 = vld [vmem:[%s2854_s9 + $0x18] sm:$0xff]  ;;  %v284_v47 = vld [vmem:[%s2851_s6] sm:$0xff]  ;;  %v285_v10 = vld [vmem:[%s2851_s6 + $0x8] sm:$0xff] }
  0x1c   :  { %722 = vperm.xlu1 %2309, %v1955_v22   ;;  %2163 = vmatprep.mubr.msk.f32.mxu0 %vm312_vm2, %v284_v47  ;;  %v286_v11 = vld [vmem:[%s2851_s6 + $0x10] sm:$0xff]  ;;  %v287_v12 = vld [vmem:[%s2851_s6 + $0x18] sm:$0xff]  ;;  %v1937_v47 = vld [vmem:[%s2848_s3 + $0x28] sm:$0xff] }
  0x1f   :  { %717 = vperm.xlu0 %2308, %v1954_v23  }
  0x20   :  { %770 = vperm.xlu1 %2309, %v1965_v24  }
  0x23   :  { %765 = vperm.xlu0 %2308, %v1964_v25  }
  0x24   :  { %760 = vperm.xlu1 %2309, %v1963_v26  }
  0x27   :  { %755 = vperm.xlu0 %2308, %v1962_v27  }
  0x28   :  { %880 = vperm.xlu1 %2309, %v1971_v28  }
  0x2b   :  { %1194 = vperm.xlu0 %2308, %v1994_v29  }
  0x2c   :  { %1189 = vperm.xlu1 %2309, %v1993_v30   ;;  %v414_v30 = vld [vmem:[%s2853_s8] sm:$0xff] }
  0x2f   :  { %1184 = vperm.xlu0 %2308, %v1992_v31   ;;  %v1940_v31 = vld [vmem:[%s2849_s4 + $0x20] sm:$0xff] }
  0x30   :  { %1179 = vperm.xlu1 %2309, %v1991_v32   ;;  %v1941_v32 = vld [vmem:[%s2849_s4 + $0x28] sm:$0xff] }
  0x33   :  { %1232 = vperm.xlu0 %2308, %v2002_v33   ;;  %v1936_v33 = vld [vmem:[%s2848_s3 + $0x20] sm:$0xff] }
  0x34   :  { %1227 = vperm.xlu1 %2309, %v2001_v34   ;;  %v1942_v34 = vld [vmem:[%s2849_s4 + $0x30] sm:$0xff] }
  0x37   :  { %1222 = vperm.xlu0 %2308, %v2000_v35   ;;  %v1943_v35 = vld [vmem:[%s2849_s4 + $0x38] sm:$0xff] }
  0x38   :  { %1217 = vperm.xlu1 %2309, %v1999_v36  }
  0x3b   :  { %1342 = vperm.xlu0 %2308, %v2008_v37  }
  0x3c   :  { %1656 = vperm.xlu1 %2309, %v2031_v38  }
  0x3f   :  { %1651 = vperm.xlu0 %2308, %v2030_v39  }
  0x40   :  { %1646 = vperm.xlu1 %2309, %v2029_v40  }
  0x43   :  { %1641 = vperm.xlu0 %2308, %v2028_v41  }
  0x44   :  { %1694 = vperm.xlu1 %2309, %v2039_v42   ;;  %v40_v42 = vld [vmem:[%s2846_s1] sm:$0xf] }
  0x47   :  { %1689 = vperm.xlu0 %2308, %v2038_v43  }
  0x48   :  { %1684 = vperm.xlu1 %2309, %v2037_v44  }
  0x4b   :  { %1679 = vperm.xlu0 %2308, %v2036_v45  }
  0x4c   :  { %1804 = vperm.xlu1 %2309, %v2045_v46  }
  0x82   :  { %v274_v50 = vpop.permute.xlu0 %273 }
  0x83   :  { %v264_v53 = vpop.permute.xlu1 %263 }
  0x86   :  { %v269_v63 = vpop.permute.xlu0 %268 }
  0x87   :  { %v259_v5 = vpop.permute.xlu1 %258 }
  0x8a   :  { %v310_v14 = vpop.permute.xlu0 %309 }
  0x8b   :  { %v305_v16 = vpop.permute.xlu1 %304 }
  0x8e   :  { %v300_v20 = vpop.permute.xlu0 %299 }
  0x8f   :  { %v295_v25 = vpop.permute.xlu1 %294 }
  0x92   :  { %v419_v36 = vpop.permute.xlu0 %418 }
  0xc5   :  { %v2143_v48 = vpop.f32.mrf.mxu0 }
  0xc6   :  { %v2151_v49 = vpop.f32.mrf.mxu1 }
  0xc7   :  { %v133_v51 = vpop.f32.mrf.mxu0  ;;  %v239_v56 = vadd.f32 %v2151_v49, %v2143_v48  ;;  %v1938_v48 = vld [vmem:[%s2848_s3 + $0x30] sm:$0xff]  ;;  %v1939_v49 = vld [vmem:[%s2848_s3 + $0x38] sm:$0xff] }
  0xc8   :  { %v233_v52 = vpop.f32.mrf.mxu1 }
  0xc9   :  { %v2146_v54 = vpop.f32.mrf.mxu0  ;;  %v234_v60 = vadd.f32 %v233_v52, %v133_v51  ;;  %v277_v2 = vadd.f32 %v264_v53, %v239_v56 }
  0xca   :  { %v2154_v55 = vpop.f32.mrf.mxu1 }
  0xcb   :  { %v249_v57 = vadd.f32 %v2154_v55, %v2146_v54  ;;  %v143_v58 = vpop.f32.mrf.mxu0  ;;  %v276_v6 = vadd.f32 %v259_v5, %v234_v60  ;;  %v281_v8 = vmax.f32 %v277_v2, 0.0  ;;  %v733_v54 = vpop.permute.xlu1 %732 }
  0xcc   :  { %v243_v59 = vpop.f32.mrf.mxu1 }
  0xcd   :  { %v279_v61 = vadd.f32 %v274_v50, %v249_v57  ;;  %v244_v62 = vadd.f32 %v243_v59, %v143_v58  ;;  %v280_v9 = vmax.f32 %v276_v6, 0.0  ;;  %v1958_v50 = vld [vmem:[%s2851_s6 + $0x20] sm:$0xff]  ;;  %v728_v57 = vpop.permute.xlu0 %727 }
  0xcf   :  { %v283_v3 = vmax.f32 %v279_v61, 0.0  ;;  %v278_v4 = vadd.f32 %v269_v63, %v244_v62 }
  0xd1   :  { %v282_v7 = vmax.f32 %v278_v4, 0.0  ;;  %2155 = vmatprep.subr.mxu0 %v283_v3  ;;  %v723_v4 = vpop.permute.xlu1 %722 }
  0xd2   :  { %2156 = vmatpush3.msra.mxu0 %v283_v3 }
  0xd3   :  { %2157 = vmatprep.subr.mxu0 %v282_v7 }
  0xd4   :  { %2158 = vmatpush3.msra.mxu0 %v282_v7 }
  0xd5   :  { %2159 = vmatprep.subr.mxu0 %v281_v8 }
  0xd6   :  { %2160 = vmatpush3.msra.mxu0 %v281_v8  ;;  %v718_v8 = vpop.permute.xlu0 %717 }
  0xd7   :  { %2161 = vmatprep.subr.mxu0 %v280_v9 }
  0xd8   :  { %2162 = vmatpush3.msra.mxu0 %v280_v9 }
  0xd9   :  { %2164 = vmatmul.mubr.msk.f32.vlgmr.msra.gmra.mxu0 %vm312_vm2, %v285_v10 }
  0xda   :  { %2166 = vmatprep.mubr.msk.f32.mxu0 %vm312_vm2, %v286_v11 }
  0xdd   :  { %2167 = vmatmul.mubr.msk.f32.gmra.mxu0 %vm312_vm2, %v287_v12 }
  0xde   :  { %2190 = vmatprep.mubr.msk.f32.mxu0 %vm50_vm1, %v1936_v33  ;;  %v1970_v33 = vld [vmem:[%s2853_s8 + $0x8] sm:$0xff] }
 0x199   :  { %v2165_v15 = vpop.f32.mrf.mxu0 }
 0x19a   :  { %v397_v22 = vadd.f32 %v2165_v15, %v300_v20  ;;  %v1960_v15 = vld [vmem:[%s2851_s6 + $0x30] sm:$0xff] }
 0x19b   :  { %v391_v17 = vpop.f32.mrf.mxu0 }
 0x19c   :  { %v392_v26 = vadd.f32 %v391_v17, %v295_v25  ;;  %v411_v28 = vmax.f32 %v397_v22, 0.0  ;;  %v771_v17 = vpop.permute.xlu1 %770 }
 0x19d   :  { %v2168_v18 = vpop.f32.mrf.mxu0 }
 0x19e   :  { %v407_v19 = vadd.f32 %v2168_v18, %v310_v14  ;;  %v410_v29 = vmax.f32 %v392_v26, 0.0  ;;  %v1959_v14 = vld [vmem:[%s2851_s6 + $0x28] sm:$0xff] }
 0x19f   :  { %v401_v21 = vpop.f32.mrf.mxu0 }
 0x1a0   :  { %v413_v23 = vmax.f32 %v407_v19, 0.0  ;;  %v402_v24 = vadd.f32 %v401_v21, %v305_v16  ;;  %v1961_v16 = vld [vmem:[%s2851_s6 + $0x38] sm:$0xff]  ;;  %v766_v19 = vpop.permute.xlu0 %765 }
 0x1a2   :  { %v412_v27 = vmax.f32 %v402_v24, 0.0  ;;  %2170 = vmatpush3.msra.mxu1 %v413_v23  ;;  %v761_v23 = vpop.permute.xlu1 %760 }
 0x1a3   :  { %2171 = vmatprep.subr.mxu1 %v2371_v13 }
 0x1a4   :  { %2172 = vmatpush3.msra.mxu1 %v412_v27 }
 0x1a5   :  { %2173 = vmatprep.subr.mxu1 %v2371_v13 }
 0x1a6   :  { %2174 = vmatpush3.msra.mxu1 %v411_v28  ;;  %v756_v28 = vpop.permute.xlu0 %755 }
 0x1a7   :  { %2175 = vmatprep.subr.mxu1 %v2371_v13 }
 0x1a8   :  { %2176 = vmatpush3.msra.mxu1 %v410_v29 }
 0x1a9   :  { %2178 = vmatmul.mubr.msk.f32.vlgmr.msra.gmra.mxu1 %vm312_vm2, %v414_v30  ;;  %2180 = vmatprep.subr.msk.mxu1 %vm63_vm0, %v2438_v0 }
 0x1aa   :  { %2181 = vmatpush3.msk.msra.mxu1 %vm63_vm0, %v2438_v0  ;;  %2182 = vmatprep.mubr.msk.f32.mxu1 %vm50_vm1, %v1940_v31 }
 0x1ad   :  { %2183 = vmatmul.mubr.msk.f32.vlgmr.msra.gmra.mxu1 %vm50_vm1, %v1941_v32 }
 0x1ae   :  { %2185 = vmatprep.mubr.msk.f32.mxu1 %vm50_vm1, %v1942_v34  ;;  %v1977_v34 = vld [vmem:[%s2849_s4 + $0x40] sm:$0xff] }
 0x1b1   :  { %2186 = vmatmul.mubr.msk.f32.gmra.mxu1 %vm50_vm1, %v1943_v35  ;;  %v1978_v35 = vld [vmem:[%s2849_s4 + $0x48] sm:$0xff] }
 0x1b2   :  { %2204 = vmatprep.mubr.msk.f32.mxu1 %vm312_vm2, %v1958_v50 }
 0x269   :  { %v490_v37 = vpop.f32.mrf.mxu1 }
 0x26a   :  { %v491_v38 = vadd.f32 %v490_v37, %v419_v36  ;;  %v1973_v36 = vld [vmem:[%s2848_s3 + $0x40] sm:$0xff]  ;;  %v1979_v37 = vld [vmem:[%s2849_s4 + $0x50] sm:$0xff] }
 0x26b   :  { %v2179_v39 = vpop.f32.mrf.mxu1 }
 0x26c   :  { %2310 = vtanh.f32 %v491_v38  ;;  %v499_v45 = vrot.slane %v491_v38, 4  ;;  %v1980_v38 = vld [vmem:[%s2849_s4 + $0x58] sm:$0xff]  ;;  %v881_v39 = vpop.permute.xlu1 %880 }
 0x26d   :  { %v2184_v51 = vpop.f32.mrf.mxu1 }
 0x26f   :  { %v591_v52 = vpop.f32.mrf.mxu1 }
 0x271   :  { %v2187_v55 = vpop.f32.mrf.mxu1 }
 0x273   :  { %v601_v61 = vpop.f32.mrf.mxu1 }
 0x279   :  { %v2643_v40 = vpop.eup %2310 }
 0x27a   :  { %v495_v41 = vmul.f32 1.442695, %v2643_v40 }
 0x27c   :  { %2312 = vpow2.f32 %v495_v41 }
 0x289   :  { %v2313_v43 = vpop.eup %2312 }
 0x28a   :  { %v497_v44 = vmul.f32 %v2313_v43, %v40_v42 }
 0x28c   :  { %v2649_v46 = vadd.f32 %v499_v45, %v497_v44 }
 0x28e   :  { %2188 = vmatprep.subr.msk.mxu0 %vm63_vm0, %v2649_v46 }
 0x28f   :  { %2189 = vmatpush3.msk.msra.mxu0 %vm63_vm0, %v2649_v46 }
 0x290   :  { %2191 = vmatmul.mubr.msk.f32.vlgmr.msra.gmra.mxu0 %vm50_vm1, %v1937_v47  ;;  %2210 = vmatprep.subr.mxu0 %v2371_v13 }
 0x291   :  { %2193 = vmatprep.mubr.msk.f32.mxu0 %vm50_vm1, %v1938_v48 }
 0x294   :  { %2194 = vmatmul.mubr.msk.f32.gmra.mxu0 %vm50_vm1, %v1939_v49 }
 0x295   :  { %2218 = vmatprep.mubr.msk.f32.mxu0 %vm2372_vm3, %v2371_v13 }
 0x350   :  { %v2192_v53 = vpop.f32.mrf.mxu0 }
 0x351   :  { %v697_v59 = vadd.f32 %v2192_v53, %v2184_v51  ;;  %v1974_v51 = vld [vmem:[%s2848_s3 + $0x48] sm:$0xff]  ;;  %v1995_v53 = vld [vmem:[%s2851_s6 + $0x40] sm:$0xff] }
 0x352   :  { %v691_v56 = vpop.f32.mrf.mxu0 }
 0x353   :  { %v692_v63 = vadd.f32 %v691_v56, %v591_v52  ;;  %v736_v5 = vadd.f32 %v723_v4, %v697_v59  ;;  %v1975_v52 = vld [vmem:[%s2848_s3 + $0x50] sm:$0xff] }
 0x354   :  { %v2195_v58 = vpop.f32.mrf.mxu0 }
 0x355   :  { %v707_v60 = vadd.f32 %v2195_v58, %v2187_v55  ;;  %v735_v9 = vadd.f32 %v718_v8, %v692_v63  ;;  %v740_v11 = vmax.f32 %v736_v5, 0.0 }
 0x356   :  { %v701_v62 = vpop.f32.mrf.mxu0 }
 0x357   :  { %v738_v2 = vadd.f32 %v733_v54, %v707_v60  ;;  %v702_v3 = vadd.f32 %v701_v62, %v601_v61  ;;  %v739_v12 = vmax.f32 %v735_v9, 0.0  ;;  %v1190_v60 = vpop.permute.xlu1 %1189 }
 0x359   :  { %v742_v6 = vmax.f32 %v738_v2, 0.0  ;;  %v737_v7 = vadd.f32 %v728_v57, %v702_v3  ;;  %v1195_v57 = vpop.permute.xlu0 %1194 }
 0x35b   :  { %v741_v10 = vmax.f32 %v737_v7, 0.0  ;;  %2196 = vmatprep.subr.mxu1 %v742_v6 }
 0x35c   :  { %2197 = vmatpush3.msra.mxu1 %v742_v6 }
 0x35d   :  { %2198 = vmatprep.subr.mxu1 %v741_v10  ;;  %v1185_v7 = vpop.permute.xlu0 %1184 }
 0x35e   :  { %2199 = vmatpush3.msra.mxu1 %v741_v10 }
 0x35f   :  { %2200 = vmatprep.subr.mxu1 %v740_v11 }
 0x360   :  { %2201 = vmatpush3.msra.mxu1 %v740_v11  ;;  %v1180_v11 = vpop.permute.xlu1 %1179 }
 0x361   :  { %2202 = vmatprep.subr.mxu1 %v739_v12 }
 0x362   :  { %2203 = vmatpush3.msra.mxu1 %v739_v12 }
 0x363   :  { %2205 = vmatmul.mubr.msk.f32.vlgmr.msra.gmra.mxu1 %vm312_vm2, %v1959_v14 }
 0x364   :  { %2207 = vmatprep.mubr.msk.f32.mxu1 %vm312_vm2, %v1960_v15 }
 0x367   :  { %2208 = vmatmul.mubr.msk.f32.gmra.mxu1 %vm312_vm2, %v1961_v16 }
 0x368   :  { %2231 = vmatprep.mubr.msk.f32.mxu1 %vm50_vm1, %v1973_v36  ;;  %v2007_v36 = vld [vmem:[%s2853_s8 + $0x10] sm:$0xff] }
 0x423   :  { %v2206_v18 = vpop.f32.mrf.mxu1 }
 0x424   :  { %v857_v25 = vadd.f32 %v2206_v18, %v761_v23  ;;  %v1997_v18 = vld [vmem:[%s2851_s6 + $0x50] sm:$0xff] }
 0x425   :  { %v851_v20 = vpop.f32.mrf.mxu1 }
 0x426   :  { %v852_v29 = vadd.f32 %v851_v20, %v756_v28  ;;  %v871_v31 = vmax.f32 %v857_v25, 0.0  ;;  %v1233_v20 = vpop.permute.xlu0 %1232 }
 0x427   :  { %v2209_v21 = vpop.f32.mrf.mxu1 }
 0x428   :  { %v867_v22 = vadd.f32 %v2209_v21, %v771_v17  ;;  %v870_v32 = vmax.f32 %v852_v29, 0.0  ;;  %v1996_v17 = vld [vmem:[%s2851_s6 + $0x48] sm:$0xff] }
 0x429   :  { %v861_v24 = vpop.f32.mrf.mxu1 }
 0x42a   :  { %v873_v26 = vmax.f32 %v867_v22, 0.0  ;;  %v862_v27 = vadd.f32 %v861_v24, %v766_v19  ;;  %v1998_v19 = vld [vmem:[%s2851_s6 + $0x58] sm:$0xff]  ;;  %v1228_v22 = vpop.permute.xlu1 %1227 }
 0x42c   :  { %v872_v30 = vmax.f32 %v862_v27, 0.0  ;;  %2211 = vmatpush3.msra.mxu0 %v873_v26  ;;  %v1223_v26 = vpop.permute.xlu0 %1222 }
 0x42d   :  { %2212 = vmatprep.subr.mxu0 %v2371_v13 }
 0x42e   :  { %2213 = vmatpush3.msra.mxu0 %v872_v30 }
 0x42f   :  { %2214 = vmatprep.subr.mxu0 %v2371_v13 }
 0x430   :  { %2215 = vmatpush3.msra.mxu0 %v871_v31  ;;  %v1218_v31 = vpop.permute.xlu1 %1217 }
 0x431   :  { %2216 = vmatprep.subr.mxu0 %v2371_v13 }
 0x432   :  { %2217 = vmatpush3.msra.mxu0 %v870_v32 }
 0x433   :  { %2219 = vmatmul.mubr.msk.f32.vlgmr.msra.gmra.mxu0 %vm312_vm2, %v1970_v33  ;;  %2221 = vmatprep.subr.msk.mxu0 %vm63_vm0, %v2438_v0 }
 0x434   :  { %2222 = vmatpush3.msk.msra.mxu0 %vm63_vm0, %v2438_v0  ;;  %2223 = vmatprep.mubr.msk.f32.mxu0 %vm50_vm1, %v1977_v34 }
 0x437   :  { %2224 = vmatmul.mubr.msk.f32.vlgmr.msra.gmra.mxu0 %vm50_vm1, %v1978_v35 }
 0x438   :  { %2226 = vmatprep.mubr.msk.f32.mxu0 %vm50_vm1, %v1979_v37  ;;  %v2014_v37 = vld [vmem:[%s2849_s4 + $0x60] sm:$0xff] }
 0x43b   :  { %2227 = vmatmul.mubr.msk.f32.gmra.mxu0 %vm50_vm1, %v1980_v38  ;;  %v2015_v38 = vld [vmem:[%s2849_s4 + $0x68] sm:$0xff] }
 0x43c   :  { %2245 = vmatprep.mubr.msk.f32.mxu0 %vm312_vm2, %v1995_v53 }
 0x4f3   :  { %v952_v41 = vpop.f32.mrf.mxu0 }
 0x4f4   :  { %v953_v42 = vadd.f32 %v952_v41, %v881_v39  ;;  %v2010_v39 = vld [vmem:[%s2848_s3 + $0x60] sm:$0xff]  ;;  %v2017_v41 = vld [vmem:[%s2849_s4 + $0x78] sm:$0xff] }
 0x4f5   :  { %v2220_v43 = vpop.f32.mrf.mxu0 }
 0x4f6   :  { %2314 = vtanh.f32 %v953_v42  ;;  %v961_v49 = vrot.slane %v953_v42, 4  ;;  %v1343_v42 = vpop.permute.xlu0 %1342 }
 0x4f7   :  { %v2225_v54 = vpop.f32.mrf.mxu0 }
 0x4f9   :  { %v1053_v55 = vpop.f32.mrf.mxu0 }
 0x4fb   :  { %v2228_v58 = vpop.f32.mrf.mxu0 }
 0x4fd   :  { %v1063_v2 = vpop.f32.mrf.mxu0 }
 0x503   :  { %v2717_v44 = vpop.eup %2314 }
 0x504   :  { %v957_v45 = vmul.f32 1.442695, %v2717_v44 }
 0x506   :  { %2316 = vpow2.f32 %v957_v45 }
 0x513   :  { %v2317_v47 = vpop.eup %2316 }
 0x514   :  { %v959_v48 = vmul.f32 %v2317_v47, %v2443_v1  ;;  %v1976_v1 = vld [vmem:[%s2848_s3 + $0x58] sm:$0xff] }
 0x516   :  { %v2721_v50 = vadd.f32 %v961_v49, %v959_v48  ;;  %v964_v48 = vadd.f32 %v2717_v44, %v2643_v40  ;;  %v2012_v40 = vld [vmem:[%s2848_s3 + $0x70] sm:$0xff]  ;;  %v2032_v44 = vld [vmem:[%s2851_s6 + $0x60] sm:$0xff] }
 0x518   :  { %2229 = vmatprep.subr.msk.mxu1 %vm63_vm0, %v2721_v50 }
 0x519   :  { %2230 = vmatpush3.msk.msra.mxu1 %vm63_vm0, %v2721_v50 }
 0x51a   :  { %2232 = vmatmul.mubr.msk.f32.vlgmr.msra.gmra.mxu1 %vm50_vm1, %v1974_v51  ;;  %2251 = vmatprep.subr.mxu1 %v2371_v13 }
 0x51b   :  { %2234 = vmatprep.mubr.msk.f32.mxu1 %vm50_vm1, %v1975_v52 }
 0x51e   :  { %2235 = vmatmul.mubr.msk.f32.gmra.mxu1 %vm50_vm1, %v1976_v1 }
 0x51f   :  { %2259 = vmatprep.mubr.msk.f32.mxu1 %vm2372_vm3, %v2371_v13 }
 0x5da   :  { %v2233_v56 = vpop.f32.mrf.mxu1 }
 0x5db   :  { %v1159_v62 = vadd.f32 %v2233_v56, %v2225_v54  ;;  %v2011_v56 = vld [vmem:[%s2848_s3 + $0x68] sm:$0xff] }
 0x5dc   :  { %v1153_v59 = vpop.f32.mrf.mxu1 }
 0x5dd   :  { %v1154_v4 = vadd.f32 %v1153_v59, %v1053_v55  ;;  %v1198_v8 = vadd.f32 %v1185_v7, %v1159_v62 }
 0x5de   :  { %v2236_v61 = vpop.f32.mrf.mxu1 }
 0x5df   :  { %v1169_v63 = vadd.f32 %v2236_v61, %v2228_v58  ;;  %v1197_v12 = vadd.f32 %v1180_v11, %v1154_v4  ;;  %v1202_v15 = vmax.f32 %v1198_v8, 0.0 }
 0x5e0   :  { %v1163_v3 = vpop.f32.mrf.mxu1 }
 0x5e1   :  { %v1200_v5 = vadd.f32 %v1195_v57, %v1169_v63  ;;  %v1164_v6 = vadd.f32 %v1163_v3, %v1063_v2  ;;  %v1201_v16 = vmax.f32 %v1197_v12, 0.0  ;;  %v1652_v63 = vpop.permute.xlu0 %1651 }
 0x5e3   :  { %v1204_v9 = vmax.f32 %v1200_v5, 0.0  ;;  %v1199_v10 = vadd.f32 %v1190_v60, %v1164_v6  ;;  %v1657_v60 = vpop.permute.xlu1 %1656 }
 0x5e5   :  { %v1203_v14 = vmax.f32 %v1199_v10, 0.0  ;;  %2237 = vmatprep.subr.mxu0 %v1204_v9 }
 0x5e6   :  { %2238 = vmatpush3.msra.mxu0 %v1204_v9 }
 0x5e7   :  { %2239 = vmatprep.subr.mxu0 %v1203_v14  ;;  %v1647_v10 = vpop.permute.xlu1 %1646 }
 0x5e8   :  { %2240 = vmatpush3.msra.mxu0 %v1203_v14 }
 0x5e9   :  { %2241 = vmatprep.subr.mxu0 %v1202_v15 }
 0x5ea   :  { %2242 = vmatpush3.msra.mxu0 %v1202_v15  ;;  %v1642_v15 = vpop.permute.xlu0 %1641 }
 0x5eb   :  { %2243 = vmatprep.subr.mxu0 %v1201_v16 }
 0x5ec   :  { %2244 = vmatpush3.msra.mxu0 %v1201_v16 }
 0x5ed   :  { %2246 = vmatmul.mubr.msk.f32.vlgmr.msra.gmra.mxu0 %vm312_vm2, %v1996_v17 }
 0x5ee   :  { %2248 = vmatprep.mubr.msk.f32.mxu0 %vm312_vm2, %v1997_v18 }
 0x5f1   :  { %2249 = vmatmul.mubr.msk.f32.gmra.mxu0 %vm312_vm2, %v1998_v19 }
 0x5f2   :  { %2272 = vmatprep.mubr.msk.f32.mxu0 %vm50_vm1, %v2010_v39  ;;  %v2044_v39 = vld [vmem:[%s2853_s8 + $0x18] sm:$0xff]  ;;  %s2326_s8 = scalar_lea.vmem %s1910_s14, 64 }
 0x5f3   :  { %p2327_p0 = scmp.ne.s32.totalorder %s1910_s14, %s2326_s8  ;;  %p2332_p2 = scmp.lt.s32.totalorder %s2326_s8, %s2326_s8 }
 0x5f5   :  { %p2333_p3 = por %p2332_p2, %p2331_p1 }
 0x5f7   :  { %p2334_p4 = pnand %p2333_p3, %p2327_p0 }
 0x6ad   :  { %v2247_v21 = vpop.f32.mrf.mxu0 }
 0x6ae   :  { %v1319_v28 = vadd.f32 %v2247_v21, %v1223_v26  ;;  %v2034_v21 = vld [vmem:[%s2851_s6 + $0x70] sm:$0xff] }
 0x6af   :  { %v1313_v23 = vpop.f32.mrf.mxu0 }
 0x6b0   :  { %v1314_v32 = vadd.f32 %v1313_v23, %v1218_v31  ;;  %v1333_v34 = vmax.f32 %v1319_v28, 0.0  ;;  %v1695_v23 = vpop.permute.xlu1 %1694 }
 0x6b1   :  { %v2250_v24 = vpop.f32.mrf.mxu0 }
 0x6b2   :  { %v1329_v25 = vadd.f32 %v2250_v24, %v1233_v20  ;;  %v1332_v35 = vmax.f32 %v1314_v32, 0.0  ;;  %v2033_v20 = vld [vmem:[%s2851_s6 + $0x68] sm:$0xff] }
 0x6b3   :  { %v1323_v27 = vpop.f32.mrf.mxu0 }
 0x6b4   :  { %v1335_v29 = vmax.f32 %v1329_v25, 0.0  ;;  %v1324_v30 = vadd.f32 %v1323_v27, %v1228_v22  ;;  %v2035_v22 = vld [vmem:[%s2851_s6 + $0x78] sm:$0xff]  ;;  %v1690_v25 = vpop.permute.xlu0 %1689 }
 0x6b6   :  { %v1334_v33 = vmax.f32 %v1324_v30, 0.0  ;;  %2252 = vmatpush3.msra.mxu1 %v1335_v29  ;;  %v1685_v29 = vpop.permute.xlu1 %1684 }
 0x6b7   :  { %2253 = vmatprep.subr.mxu1 %v2371_v13 }
 0x6b8   :  { %2254 = vmatpush3.msra.mxu1 %v1334_v33 }
 0x6b9   :  { %2255 = vmatprep.subr.mxu1 %v2371_v13 }
 0x6ba   :  { %2256 = vmatpush3.msra.mxu1 %v1333_v34  ;;  %v1680_v34 = vpop.permute.xlu0 %1679 }
 0x6bb   :  { %2257 = vmatprep.subr.mxu1 %v2371_v13 }
 0x6bc   :  { %2258 = vmatpush3.msra.mxu1 %v1332_v35 }
 0x6bd   :  { %2260 = vmatmul.mubr.msk.f32.vlgmr.msra.gmra.mxu1 %vm312_vm2, %v2007_v36  ;;  %2262 = vmatprep.subr.msk.mxu1 %vm63_vm0, %v2438_v0 }
 0x6be   :  { %2263 = vmatpush3.msk.msra.mxu1 %vm63_vm0, %v2438_v0  ;;  %2264 = vmatprep.mubr.msk.f32.mxu1 %vm50_vm1, %v2014_v37  ;;  %v2016_v0 = vld [vmem:[%s2849_s4 + $0x70] sm:$0xff] }
 0x6c1   :  { %2265 = vmatmul.mubr.msk.f32.vlgmr.msra.gmra.mxu1 %vm50_vm1, %v2015_v38 }
 0x6c2   :  { %2267 = vmatprep.mubr.msk.f32.mxu1 %vm50_vm1, %v2016_v0  ;;  %v1805_v0 = vpop.permute.xlu1 %1804 }
 0x6c5   :  { %2268 = vmatmul.mubr.msk.f32.gmra.mxu1 %vm50_vm1, %v2017_v41 }
 0x6c6   :  { %2286 = vmatprep.mubr.msk.f32.mxu1 %vm312_vm2, %v2032_v44 }
 0x77d   :  { %v1414_v43 = vpop.f32.mrf.mxu1 }
 0x77e   :  { %v1415_v45 = vadd.f32 %v1414_v43, %v1343_v42 }
 0x77f   :  { %v2261_v47 = vpop.f32.mrf.mxu1 }
 0x780   :  { %2318 = vtanh.f32 %v1415_v45  ;;  %v1423_v54 = vrot.slane %v1415_v45, 4 }
 0x781   :  { %v2266_v57 = vpop.f32.mrf.mxu1 }
 0x783   :  { %v1515_v58 = vpop.f32.mrf.mxu1 }
 0x785   :  { %v2269_v62 = vpop.f32.mrf.mxu1 }
 0x787   :  { %v1525_v5 = vpop.f32.mrf.mxu1 }
 0x78d   :  { %v2319_v49 = vpop.eup %2318 }
 0x78e   :  { %v1419_v51 = vmul.f32 1.442695, %v2319_v49  ;;  %v2791_v52 = vadd.f32 %v2319_v49, %v964_v48 }
 0x790   :  { %2320 = vpow2.f32 %v1419_v51 }
 0x79d   :  { %v2321_v1 = vpop.eup %2320 }
 0x79e   :  { %v1421_v53 = vmul.f32 %v2321_v1, %v2649_v46  ;;  %v2013_v46 = vld [vmem:[%s2848_s3 + $0x78] sm:$0xff] }
 0x7a0   :  { %v1425_v55 = vadd.f32 %v1423_v54, %v1421_v53 }
 0x7a2   :  { %2270 = vmatprep.subr.msk.mxu0 %vm63_vm0, %v1425_v55  ;;  %1891 = vst.msk [vmem:[#allocation2 + $0x4] sm:$0xf] %vm1889_vm4, %v1425_v55 }
 0x7a3   :  { %2271 = vmatpush3.msk.msra.mxu0 %vm63_vm0, %v1425_v55 }
 0x7a4   :  { %2273 = vmatmul.mubr.msk.f32.vlgmr.msra.gmra.mxu0 %vm50_vm1, %v2011_v56  ;;  %2292 = vmatprep.subr.mxu0 %v2371_v13 }
 0x7a5   :  { %2275 = vmatprep.mubr.msk.f32.mxu0 %vm50_vm1, %v2012_v40 }
 0x7a8   :  { %2276 = vmatmul.mubr.msk.f32.gmra.mxu0 %vm50_vm1, %v2013_v46 }
 0x7a9   :  { %2300 = vmatprep.mubr.msk.f32.mxu0 %vm2372_vm3, %v2371_v13 }
 0x864   :  { %v2274_v59 = vpop.f32.mrf.mxu0 }
 0x865   :  { %v1621_v3 = vadd.f32 %v2274_v59, %v2266_v57 }
 0x866   :  { %v1615_v61 = vpop.f32.mrf.mxu0 }
 0x867   :  { %v1616_v7 = vadd.f32 %v1615_v61, %v1515_v58  ;;  %v1660_v11 = vadd.f32 %v1647_v10, %v1621_v3 }
 0x868   :  { %v2277_v2 = vpop.f32.mrf.mxu0 }
 0x869   :  { %v1631_v4 = vadd.f32 %v2277_v2, %v2269_v62  ;;  %v1659_v16 = vadd.f32 %v1642_v15, %v1616_v7  ;;  %v1664_v18 = vmax.f32 %v1660_v11, 0.0 }
 0x86a   :  { %v1625_v6 = vpop.f32.mrf.mxu0 }
 0x86b   :  { %v1662_v8 = vadd.f32 %v1657_v60, %v1631_v4  ;;  %v1626_v9 = vadd.f32 %v1625_v6, %v1525_v5  ;;  %v1663_v19 = vmax.f32 %v1659_v16, 0.0 }
 0x86d   :  { %v1666_v12 = vmax.f32 %v1662_v8, 0.0  ;;  %v1661_v14 = vadd.f32 %v1652_v63, %v1626_v9 }
 0x86f   :  { %v1665_v17 = vmax.f32 %v1661_v14, 0.0  ;;  %2278 = vmatprep.subr.mxu1 %v1666_v12 }
 0x870   :  { %2279 = vmatpush3.msra.mxu1 %v1666_v12 }
 0x871   :  { %2280 = vmatprep.subr.mxu1 %v1665_v17 }
 0x872   :  { %2281 = vmatpush3.msra.mxu1 %v1665_v17 }
 0x873   :  { %2282 = vmatprep.subr.mxu1 %v1664_v18 }
 0x874   :  { %2283 = vmatpush3.msra.mxu1 %v1664_v18 }
 0x875   :  { %2284 = vmatprep.subr.mxu1 %v1663_v19 }
 0x876   :  { %2285 = vmatpush3.msra.mxu1 %v1663_v19 }
 0x877   :  { %2287 = vmatmul.mubr.msk.f32.vlgmr.msra.gmra.mxu1 %vm312_vm2, %v2033_v20 }
 0x878   :  { %2289 = vmatprep.mubr.msk.f32.mxu1 %vm312_vm2, %v2034_v21 }
 0x87b   :  { %2290 = vmatmul.mubr.msk.f32.gmra.mxu1 %vm312_vm2, %v2035_v22 }
 0x937   :  { %v2288_v24 = vpop.f32.mrf.mxu1 }
 0x938   :  { %v1781_v31 = vadd.f32 %v2288_v24, %v1685_v29 }
 0x939   :  { %v1775_v26 = vpop.f32.mrf.mxu1 }
 0x93a   :  { %v1776_v35 = vadd.f32 %v1775_v26, %v1680_v34  ;;  %v1795_v37 = vmax.f32 %v1781_v31, 0.0 }
 0x93b   :  { %v2291_v27 = vpop.f32.mrf.mxu1 }
 0x93c   :  { %v1791_v28 = vadd.f32 %v2291_v27, %v1695_v23  ;;  %v1794_v38 = vmax.f32 %v1776_v35, 0.0 }
 0x93d   :  { %v1785_v30 = vpop.f32.mrf.mxu1 }
 0x93e   :  { %v1797_v32 = vmax.f32 %v1791_v28, 0.0  ;;  %v1786_v33 = vadd.f32 %v1785_v30, %v1690_v25 }
 0x940   :  { %v1796_v36 = vmax.f32 %v1786_v33, 0.0  ;;  %2293 = vmatpush3.msra.mxu0 %v1797_v32 }
 0x941   :  { %2294 = vmatprep.subr.mxu0 %v2371_v13 }
 0x942   :  { %2295 = vmatpush3.msra.mxu0 %v1796_v36 }
 0x943   :  { %2296 = vmatprep.subr.mxu0 %v2371_v13 }
 0x944   :  { %2297 = vmatpush3.msra.mxu0 %v1795_v37 }
 0x945   :  { %2298 = vmatprep.subr.mxu0 %v2371_v13 }
 0x946   :  { %2299 = vmatpush3.msra.mxu0 %v1794_v38 }
 0x947   :  { %2301 = vmatmul.mubr.msk.f32.vlgmr.msra.gmra.mxu0 %vm312_vm2, %v2044_v39 }
 0xa07   :  { %v1876_v41 = vpop.f32.mrf.mxu0 }
 0xa08   :  { %v1877_v42 = vadd.f32 %v1876_v41, %v1805_v0 }
 0xa09   :  { %v2302_v43 = vpop.f32.mrf.mxu0 }
 0xa0a   :  { %2322 = vtanh.f32 %v1877_v42 }
 0xa17   :  { %v2323_v45 = vpop.eup %2322 }
 0xa18   :  { %v1881_v47 = vmul.f32 1.442695, %v2323_v45  ;;  %v1888_v48 = vadd.f32 %v2323_v45, %v2791_v52 }
 0xa1a   :  { %2324 = vpow2.f32 %v1881_v47  ;;  %1892 = vst.msk [vmem:[#allocation4] sm:$0xf] %vm1889_vm4, %v1888_v48 }
 0xa1b   :  { %2337 = shalt.err (!%p2334_p4)
}
 0xa1c   :  { %1912 = dma.vmem_to_hbm [thread:$0]  %s1910_s14, 64, %s2856_s11, [#allocation5]   ;;  %v1885_v49 = vrot.slane %v1877_v42, 4 }
 0xa1d   :  { %s2374_s17 = smov [#allocation2]  }
 0xa1e   :  { %s1899_s18 = sshll.u32 %s2374_s17, 4  ;;  %s1900_s18 = int_to_ptr.vmem [resolvable:$true] %s1899_s18 }
 0xa1f   :  { %s2346_s19 = scalar_lea.vmem %s1900_s18, 128  ;;  %p2351_p6 = scmp.lt.s32.totalorder %s1900_s18, %s1900_s18 }
 0xa20   :  { %p2347_p5 = scmp.ne.s32.totalorder %s1900_s18, %s2346_s19  ;;  %p2352_p7 = scmp.lt.s32.totalorder %s2346_s19, %s2346_s19 }
 0xa22   :  { %p2353_p8 = por %p2352_p7, %p2351_p6 }
 0xa24   :  { %p2354_p9 = pnand %p2353_p8, %p2347_p5 }
 0xa27   :  { %v2325_v13 = vpop.eup %2324 }
 0xa28   :  { %v1883_v51 = vmul.f32 %v2325_v13, %v2721_v50 }
 0xa2a   :  { %v1887_v52 = vadd.f32 %v1885_v49, %v1883_v51 }
 0xa2c   :  { %1890 = vst.msk [vmem:[#allocation2] sm:$0xf] %vm1889_vm4, %v1887_v52 }
 0xa2d   :  { %2357 = shalt.err (!%p2354_p9)
}
 0xa2e   :  { %1902 = dma.vmem_to_hbm [thread:$0]  %s1900_s18, 128, %s2855_s10, [#allocation3]  }
 0xa2f   :  { %2366 = dma.done.wait [#allocation3], 128  }
 0xa30   :  { %2367 = vsyncadd [#allocation3], 4294967168 }
 0xa31   :  { %2368 = dma.done.wait [#allocation5], 64  }
 0xa32   :  { %2369 = vsyncadd [#allocation5], 4294967232 }
 0xa33   :  { %1919 = vsyncpa [#allocation3], 1 }
 0xa34   :  { %1920 = vsyncpa [#allocation5], 1 }

</bundles_post_ra>
